<compile_context>
chip_gen: v7x
topology: tpu7x:2x2x1
jax: 0.10.0
libtpu: 0.0.40
codegen_flags: <defaults>
</compile_context>

<pallas_src>
import math

import jax
import jax.numpy as jnp
from jax.experimental import pallas as pl
from jax.experimental.pallas import tpu as pltpu


def _round_up(v, m):
    return ((v + m - 1) // m) * m


# ---------------------------------------------------------------------------
# Kernel: fused Linear -> (BN folded) -> ReLU -> (Dropout=id) -> Linear
# ---------------------------------------------------------------------------
def _mlp2_kernel(x_ref, w1_ref, b1_ref, w2_ref, b2_ref, o_ref):
    # x streams as fp32 (no wrapper-side pad/cast pass); cast to bf16 in VMEM
    # for the MXU, accumulate in fp32.
    x = x_ref[...].astype(jnp.bfloat16)
    h = jnp.dot(x, w1_ref[...], preferred_element_type=jnp.float32)
    h = h + b1_ref[...]                # eval-mode BN already folded into W1/b1
    h = jnp.maximum(h, 0.0)            # ReLU; Dropout is identity in eval mode
    out = jnp.dot(h.astype(jnp.bfloat16), w2_ref[...],
                  preferred_element_type=jnp.float32)
    # NOTE: rows are fully independent -- required for the ragged last block
    # (grid = cdiv(n, tile)); never add a cross-row reduction here.
    o_ref[...] = (out + b2_ref[...]).astype(o_ref.dtype)


# ---------------------------------------------------------------------------
# Tile / VMEM sizing
# ---------------------------------------------------------------------------
def _vmem_capacity_bytes(default_bytes=64 * 1024 * 1024):
    try:
        return int(pltpu.get_tpu_info().vmem_capacity_bytes)
    except Exception:
        return default_bytes  # conservative (v7x per-TC size)


def _resident_bytes(in_feats, hid_pad, out_feats):
    # 2x: Pallas double-buffers every input, even constant-index_map residents.
    return 2 * (in_feats * hid_pad * 2      # W1' (bf16)
                + hid_pad * 4               # b1' (f32)
                + hid_pad * out_feats * 2   # W2  (bf16)
                + out_feats * 4)            # b2  (f32)


def _streamed_bytes(tile, in_feats, hid_pad, out_feats):
    return (2 * tile * in_feats * 4      # double-buffered x tile (f32)
            + tile * in_feats * 2        # in-kernel bf16 copy of x tile
            + tile * hid_pad * 4         # fp32 hidden activation
            + tile * hid_pad * 2         # bf16 hidden for second matmul
            + 2 * tile * out_feats * 4)  # double-buffered output tile (f32)


def _pick_tile_rows(n, in_feats, hid_pad, out_feats, tile_rows, vmem_budget):
    resident = _resident_bytes(in_feats, hid_pad, out_feats)
    if resident > vmem_budget:
        # TODO(synk): for in_feats*hidden too large to keep resident, add a
        # K-reduction grid axis (stream W1 row-blocks into an fp32 VMEM
        # accumulator with 'arbitrary' semantics + pl.when init/finalize).
        raise ValueError(
            f"Resident MLP weights ({resident} B double-buffered) exceed the "
            f"VMEM budget ({vmem_budget} B); a K-tiled variant is required.")
    tile = max(8, min(_round_up(tile_rows, 8), _round_up(n, 8)))
    while (tile > 8 and
           resident + _streamed_bytes(tile, in_feats, hid_pad, out_feats)
           > vmem_budget):
        tile = max(8, ((tile // 2) // 8) * 8)
    return tile


# ---------------------------------------------------------------------------
# Fused 2-layer MLP wrapper
# ---------------------------------------------------------------------------
def mlp2_pallas(x, w1_t, b1, w2_t, b2, *, tile_rows=2048):
    """Fused 2-layer MLP. Inputs:
        x    : [N, in]     fp32 node features (streamed as-is, no pad/cast)
        w1_t : [in, hid]   fp32 first-layer weight, BN already folded, transposed
        b1   : [1, hid]    fp32 first-layer bias, BN already folded
        w2_t : [hid, out]  fp32 second-layer weight, transposed
        b2   : [1, out]    fp32 second-layer bias
    Returns [N, out] fp32.
    """
    n, in_feats = x.shape
    hidden = w1_t.shape[1]
    out_feats = w2_t.shape[1]

    # Only the resident weight dims (hidden) are padded, for MXU alignment.
    # Padded hidden lanes carry zero weight + zero bias -> relu(0)=0 and zero
    # W2 rows -> exact.  x and the output keep their true feature widths so no
    # wrapper-side pad / cast / slice passes touch the streamed arrays.
    hid_align = 256 if hidden >= 256 else 128   # v6e/v7x MXU is 2x256^2
    hid_pad = _round_up(hidden, hid_align)

    cap = _vmem_capacity_bytes()
    # ~40 MiB on v7x (64 MiB/TC), ~80 MiB on v5e/v6e (128 MiB).
    vmem_budget = min(int(cap * 0.625), 80 * 1024 * 1024)

    tile = _pick_tile_rows(n, in_feats, hid_pad, out_feats, tile_rows,
                           vmem_budget)
    # Keep >=2 grid steps so both v7x TensorCores get work (no-op on 1-TC chips).
    if n >= 16:
        tile = min(tile, _round_up((n + 1) // 2, 8))
    grid = (pl.cdiv(n, tile),)

    # Tiny one-time ops on resident params (negligible vs streaming x / out).
    w1_p = jnp.pad(w1_t, ((0, 0), (0, hid_pad - hidden))).astype(jnp.bfloat16)
    b1_p = jnp.pad(b1, ((0, 0), (0, hid_pad - hidden))).astype(jnp.float32)
    w2_p = jnp.pad(w2_t, ((0, hid_pad - hidden), (0, 0))).astype(jnp.bfloat16)
    b2_p = b2.astype(jnp.float32)

    flops = 2 * n * (in_feats * hid_pad + hid_pad * out_feats)
    bytes_accessed = (n * in_feats * 4 + w1_p.size * 2 + w2_p.size * 2
                      + b1_p.size * 4 + b2_p.size * 4 + n * out_feats * 4)

    est_vmem = (_resident_bytes(in_feats, hid_pad, out_feats)
                + _streamed_bytes(tile, in_feats, hid_pad, out_feats))
    vmem_limit = min(cap, 128 * 1024 * 1024,
                     max(est_vmem + 4 * 1024 * 1024, 16 * 1024 * 1024))

    out = pl.pallas_call(
        _mlp2_kernel,
        out_shape=jax.ShapeDtypeStruct((n, out_feats), jnp.float32),
        grid_spec=pl.GridSpec(
            grid=grid,
            in_specs=[
                pl.BlockSpec((tile, in_feats), lambda i: (i, 0)),      # x (streamed)
                pl.BlockSpec((in_feats, hid_pad), lambda i: (0, 0)),   # W1' (resident)
                pl.BlockSpec((1, hid_pad), lambda i: (0, 0)),          # b1'
                pl.BlockSpec((hid_pad, out_feats), lambda i: (0, 0)),  # W2
                pl.BlockSpec((1, out_feats), lambda i: (0, 0)),        # b2
            ],
            out_specs=pl.BlockSpec((tile, out_feats), lambda i: (i, 0)),
        ),
        compiler_params=pltpu.CompilerParams(
            dimension_semantics=("parallel",),
            vmem_limit_bytes=int(vmem_limit)),
        cost_estimate=pl.CostEstimate(flops=int(flops), transcendentals=0,
                                      bytes_accessed=int(bytes_accessed)),
    )(x.astype(jnp.float32), w1_p, b1_p, w2_p, b2_p)

    return out


# ---------------------------------------------------------------------------
# Parameter construction (deterministic, mirrors PlainSAGN.__init__ / MLP
# reset_parameters: xavier_uniform with gain=sqrt(2), zero bias, BN defaults).
# ---------------------------------------------------------------------------
def xavier_uniform(key, fan_out, fan_in, gain):
    # PyTorch Linear weight shape is (out, in); bound = gain*sqrt(6/(fan_in+fan_out))
    bound = gain * math.sqrt(6.0 / (fan_in + fan_out))
    return jax.random.uniform(key, (fan_out, fan_in), jnp.float32, -bound, bound)


def make_plain_sagn_params(key, in_feats, hidden, out_feats):
    gain = math.sqrt(2.0)  # calculate_gain('relu')
    k1, k2 = jax.random.split(key, 2)
    w1 = xavier_uniform(k1, hidden, in_feats, gain)      # (hidden, in)
    b1 = jnp.zeros((1, hidden), jnp.float32)
    w2 = xavier_uniform(k2, out_feats, hidden, gain)     # (out, hidden)
    b2 = jnp.zeros((1, out_feats), jnp.float32)
    # BatchNorm1d(hidden) after reset_parameters(): gamma=1, beta=0, mean=0, var=1
    gamma = jnp.ones((1, hidden), jnp.float32)
    beta = jnp.zeros((1, hidden), jnp.float32)
    rmean = jnp.zeros((1, hidden), jnp.float32)
    rvar = jnp.ones((1, hidden), jnp.float32)
    return dict(w1=w1, b1=b1, w2=w2, b2=b2, gamma=gamma, beta=beta,
                rmean=rmean, rvar=rvar)


def fold_bn_into_linear(params, eps=1e-5):
    """Eval-mode BN is affine -> fold into the first Linear. Exact (eval only)."""
    scale = params["gamma"] / jnp.sqrt(params["rvar"] + eps)      # (1, hidden)
    shift = params["beta"] - params["rmean"] * scale              # (1, hidden)
    w1f_t = params["w1"].T * scale                                # (in, hidden)
    b1f = params["b1"] * scale + shift                            # (1, hidden)
    return w1f_t, b1f


def plain_sagn_forward(feats, label_emb, params, *, tile_rows=2048):
    """PlainSAGN.forward with use_features=True, use_labels=False (eval mode).

    feats: list of [N, in_feats] arrays (only feats[-1] is used).
    label_emb: [N, label_in_feats] (unused when use_labels=False).
    Returns (out, a) with a = None, matching the PyTorch module.
    """
    x = feats[-1]  # input_drop is identity in eval mode
    w1f_t, b1f = fold_bn_into_linear(params)
    out = mlp2_pallas(x, w1f_t, b1f, params["w2"].T, params["b2"],
                      tile_rows=tile_rows)
    a = None
    return out, a


if __name__ == "__main__":
    # Small shapes consistent with the module; deliberately non-multiples of
    # 8 / 128 / tile size to exercise the ragged-last-block and unpadded paths.
    N = 100            # number of nodes (not a tile multiple)
    IN_FEATS = 64
    HIDDEN = 96
    OUT_FEATS = 40
    LABEL_IN_FEATS = 16
    N_HOPS = 3         # length of the feats list (only the last hop is used)

    key = jax.random.PRNGKey(0)
    k_params, k_feats, k_label = jax.random.split(key, 3)

    params = make_plain_sagn_params(k_params, IN_FEATS, HIDDEN, OUT_FEATS)

    feat_keys = jax.random.split(k_feats, N_HOPS)
    feats = [jax.random.normal(fk, (N, IN_FEATS), jnp.float32) for fk in feat_keys]
    label_emb = jax.random.normal(k_label, (N, LABEL_IN_FEATS), jnp.float32)

    out, a = plain_sagn_forward(feats, label_emb, params)
    out = jax.block_until_ready(out)
    assert out.shape == (N, OUT_FEATS)
    assert a is None

    # Cross-check against a plain-JAX reference of the same forward, using the
    # same bf16-quantized matmul datapath (fp32 accumulation) as the kernel.
    x = feats[-1]
    w1f_t, b1f = fold_bn_into_linear(params)
    q = lambda arr: arr.astype(jnp.bfloat16)
    h = jnp.dot(q(x), q(w1f_t), preferred_element_type=jnp.float32) + b1f
    h = jnp.maximum(h, 0.0)
    ref = jnp.dot(q(h), q(params["w2"].T),
                  preferred_element_type=jnp.float32) + params["b2"]
    assert jnp.allclose(out, ref, atol=2e-2, rtol=2e-2), (
        float(jnp.max(jnp.abs(out - ref))))

    print("KERNEL_OK")
</pallas_src>

<mosaic_0001>
module attributes {stable_mosaic.version = 11 : i64} {
  func.func @_mlp2_kernel(%arg0: i32, %arg1: memref<56x64xf32, #tpu.memory_space<vmem>>, %arg2: memref<64x128xbf16, #tpu.memory_space<vmem>>, %arg3: memref<1x128xf32, #tpu.memory_space<vmem>>, %arg4: memref<128x40xbf16, #tpu.memory_space<vmem>>, %arg5: memref<1x40xf32, #tpu.memory_space<vmem>>, %arg6: memref<56x40xf32, #tpu.memory_space<vmem>>) attributes {dimension_semantics = [#tpu.dimension_semantics<parallel>], iteration_bounds = array<i64: 2>, scalar_prefetch = 0 : i64, scratch_operands = 0 : i64, tpu.core_type = #tpu.core_type<tc>, window_params = [{transform_indices = @transform_0, window_bounds = array<i64: 56, 64>}, {pipeline_mode = #tpu.pipeline_mode<synchronous>, transform_indices = @transform_1, window_bounds = array<i64: 64, 128>}, {pipeline_mode = #tpu.pipeline_mode<synchronous>, transform_indices = @transform_2, window_bounds = array<i64: 1, 128>}, {pipeline_mode = #tpu.pipeline_mode<synchronous>, transform_indices = @transform_3, window_bounds = array<i64: 128, 40>}, {pipeline_mode = #tpu.pipeline_mode<synchronous>, transform_indices = @transform_4, window_bounds = array<i64: 1, 40>}, {transform_indices = @transform_5, window_bounds = array<i64: 56, 40>}]} {
    %c0 = arith.constant 0 : index
    %c0_0 = arith.constant 0 : index
    %0 = vector.load %arg1[%c0, %c0_0] : memref<56x64xf32, #tpu.memory_space<vmem>>, vector<56x64xf32>
    %1 = arith.truncf %0 : vector<56x64xf32> to vector<56x64xbf16>
    %c0_1 = arith.constant 0 : index
    %c0_2 = arith.constant 0 : index
    %2 = vector.load %arg2[%c0_1, %c0_2] : memref<64x128xbf16, #tpu.memory_space<vmem>>, vector<64x128xbf16>
    %cst = arith.constant dense<0.000000e+00> : vector<56x128xf32>
    %3 = tpu.matmul %1, %2, %cst {dimension_numbers = #tpu.dot_dimension_numbers<[1], [0], [0], [1], [0, 0, 1, 1], [], []>} : vector<56x64xbf16>, vector<64x128xbf16>, vector<56x128xf32> -> vector<56x128xf32>
    %c0_3 = arith.constant 0 : index
    %c0_4 = arith.constant 0 : index
    %4 = vector.load %arg3[%c0_3, %c0_4] : memref<1x128xf32, #tpu.memory_space<vmem>>, vector<1x128xf32>
    %5 = vector.broadcast %4 : vector<1x128xf32> to vector<56x128xf32>
    %6 = arith.addf %3, %5 : vector<56x128xf32>
    %cst_5 = arith.constant 0.000000e+00 : f32
    %7 = vector.broadcast %cst_5 : f32 to vector<56x128xf32>
    %8 = arith.maximumf %6, %7 : vector<56x128xf32>
    %9 = arith.truncf %8 : vector<56x128xf32> to vector<56x128xbf16>
    %c0_6 = arith.constant 0 : index
    %c0_7 = arith.constant 0 : index
    %10 = vector.load %arg4[%c0_6, %c0_7] : memref<128x40xbf16, #tpu.memory_space<vmem>>, vector<128x40xbf16>
    %cst_8 = arith.constant dense<0.000000e+00> : vector<56x40xf32>
    %11 = tpu.matmul %9, %10, %cst_8 {dimension_numbers = #tpu.dot_dimension_numbers<[1], [0], [0], [1], [0, 0, 1, 1], [], []>} : vector<56x128xbf16>, vector<128x40xbf16>, vector<56x40xf32> -> vector<56x40xf32>
    %c0_9 = arith.constant 0 : index
    %c0_10 = arith.constant 0 : index
    %12 = vector.load %arg5[%c0_9, %c0_10] : memref<1x40xf32, #tpu.memory_space<vmem>>, vector<1x40xf32>
    %13 = vector.broadcast %12 : vector<1x40xf32> to vector<56x40xf32>
    %14 = arith.addf %11, %13 : vector<56x40xf32>
    %c0_11 = arith.constant 0 : index
    %c0_12 = arith.constant 0 : index
    %15 = vector.load %arg6[%c0_11, %c0_12] : memref<56x40xf32, #tpu.memory_space<vmem>>, vector<56x40xf32>
    tpu.vector_store %arg6[%c0_11, %c0_12], %14 {strides = array<i32>} : memref<56x40xf32, #tpu.memory_space<vmem>>, vector<56x40xf32>,
    return
  }
  func.func @transform_0(%arg0: i32) -> (i32, i32) {
    %c0_i32 = arith.constant 0 : i32
    %c0_i32_0 = arith.constant 0 : i32
    return %arg0, %c0_i32 : i32, i32
  }
  func.func @transform_1(%arg0: i32) -> (i32, i32) {
    %c0_i32 = arith.constant 0 : i32
    %c0_i32_0 = arith.constant 0 : i32
    %c0_i32_1 = arith.constant 0 : i32
    return %c0_i32, %c0_i32_0 : i32, i32
  }
  func.func @transform_2(%arg0: i32) -> (i32, i32) {
    %c0_i32 = arith.constant 0 : i32
    %c0_i32_0 = arith.constant 0 : i32
    %c0_i32_1 = arith.constant 0 : i32
    return %c0_i32, %c0_i32_0 : i32, i32
  }
  func.func @transform_3(%arg0: i32) -> (i32, i32) {
    %c0_i32 = arith.constant 0 : i32
    %c0_i32_0 = arith.constant 0 : i32
    %c0_i32_1 = arith.constant 0 : i32
    return %c0_i32, %c0_i32_0 : i32, i32
  }
  func.func @transform_4(%arg0: i32) -> (i32, i32) {
    %c0_i32 = arith.constant 0 : i32
    %c0_i32_0 = arith.constant 0 : i32
    %c0_i32_1 = arith.constant 0 : i32
    return %c0_i32, %c0_i32_0 : i32, i32
  }
  func.func @transform_5(%arg0: i32) -> (i32, i32) {
    %c0_i32 = arith.constant 0 : i32
    %c0_i32_0 = arith.constant 0 : i32
    return %arg0, %c0_i32 : i32, i32
  }
}

</mosaic_0001>

<bundles_post_ra>
// kernel: tpu_custom_call.1
= control target key start
LH: loop header
LB: loop body
LE: loop exit
PB: predicated region body
PF: predicated region fallthrough
CT: control target
= control target key end

     0   :  { %s1089_s18 = smov 0   ;;  %s1091_s19 = smov 0   ;;  %s1245_s0 = inlined_call_operand.vmem [shape: f32[100,64], index: 0, kind: input, shape index: {}]   ;;  %s1246_s1 = inlined_call_operand.vmem [shape: bf16[64,128], index: 1, kind: input, shape index: {}]   ;;  %s1247_s2 = inlined_call_operand.vmem [shape: f32[1,128], index: 2, kind: input, shape index: {}]   ;;  %s1248_s3 = inlined_call_operand.vmem [shape: bf16[128,40], index: 3, kind: input, shape index: {}]   ;;  %s1249_s4 = inlined_call_operand.vmem [shape: f32[1,40], index: 4, kind: input, shape index: {}]   ;;  %s1250_s5 = inlined_call_operand.vmem [shape: f32[100,40], index: 5, kind: output, shape index: {}]  }
   0x1   :  { %s1093_s20 = smov 0  }
   0x2 LB: > { %s1102_s21 = sadd.s32 4294967295, %s1025_s20   ;;  %s1104_s22 = sadd.s32 1, %s1025_s20   ;;  %s1025_s20 = sphi %s1093_s20, %s1257_s20   ;;  %s1021_s19 = sphi %s1091_s19, %s1256_s19   ;;  %s1017_s18 = sphi %s1089_s18, %s1255_s18  }
   0x3   : > { %s129_s23 = ssub.s32 %s1025_s20, %s1104_s22  ;;  %s132_s24 = sadd.s32 1, %s1021_s19 }
   0x4   : > { %p130_p0 = scmp.eq.s32.totalorder %s129_s23, 0  ;;  %p142_p1 = scmp.ne.s32.totalorder %s1021_s19, %s1017_s18 }
   0x5   : > { %p143_p2 = scmp.eq.s32.totalorder %s1102_s21, 1  ;;  %p772_p3 = scmp.ge.s32.totalorder %s1025_s20, 1 }
   0x6   : > { %s1112_s25 = scalar_select %p130_p0, %s1021_s19, %s132_s24  }
   0x7   : > { %p1114_p4 = por %p143_p2, %p142_p1  ;;  %p196_p5 = scmp.lt.s32.totalorder %s1025_s20, 3 }
   0x9   : > { %p197_p6 = pnand %p772_p3, %p196_p5 }
   0xa   : > { %v955_v0 = vld [vmem:[%s1246_s1] sm:$0xff] (!%p197_p6)   ;;  %s1122_s29 = smul.u32 (!%p197_p6), 7, %s1102_s21  ;;  %v956_v1 = vld [vmem:[%s1246_s1 + $0x8] sm:$0xff] (!%p197_p6)   ;;  %v957_v2 = vld [vmem:[%s1246_s1 + $0x10] sm:$0xff] (!%p197_p6)   ;;  %vm297_vm0 = vcmask (!%p197_p6), 523264   ;;  %s224_s16 = sand.u32 (!%p197_p6), 1, %s1017_s18  }
   0xb   : > { %200 = sbr.rel (%p197_p6) target bundleno = 536 (0x218), region = 40  ;;  %825 = vmatprep.subr.bf16.mxu0 (!%p197_p6), %v955_v0  ;;  %v959_v3 = vld [vmem:[%s1248_s3] sm:$0xff] (!%p197_p6)   ;;  %v960_v4 = vld [vmem:[%s1248_s3 + $0x8] sm:$0xff] (!%p197_p6)   ;;  %v958_v5 = vld [vmem:[%s1246_s1 + $0x18] sm:$0xff] (!%p197_p6)   ;;  %vm520_vm1 = vcmask (!%p197_p6), 326656  }
   0xc   : > { %p232_p7 = scmp.lt.s32.totalorder (!%p197_p6), %s1122_s29, 12  ;;  %826 = vmatpush3.bf16.msra.mxu0 (!%p197_p6), %v955_v0  ;;  %841 = vmatprep.subr.bf16.mxu1 (!%p197_p6), %v959_v3  ;;  %v961_v10 = vld [vmem:[%s1248_s3 + $0x10] sm:$0xff] (!%p197_p6)   ;;  %v962_v14 = vld [vmem:[%s1248_s3 + $0x18] sm:$0xff] (!%p197_p6)   ;;  %v963_v17 = vld [vmem:[%s1248_s3 + $0x20] sm:$0xff] (!%p197_p6)  }
   0xd   : > { %827 = vmatprep.subr.bf16.mxu0 (!%p197_p6), %v956_v1  ;;  %842 = vmatpush3.bf16.msra.mxu1 (!%p197_p6), %v959_v3  ;;  %v964_v19 = vld [vmem:[%s1248_s3 + $0x28] sm:$0xff] (!%p197_p6)   ;;  %v965_v21 = vld [vmem:[%s1248_s3 + $0x30] sm:$0xff] (!%p197_p6)   ;;  %v966_v22 = vld [vmem:[%s1248_s3 + $0x38] sm:$0xff] (!%p197_p6)  }
   0xe   : > { %843 = vmatprep.subr.bf16.mxu1 (!%p197_p6), %v960_v4  ;;  %v774_v23 = vld [vmem:[%s1247_s2] ss:$0 sm:$0xff] (!%p197_p6) }
   0xf   : > { %v783_v50 = vld [vmem:[%s1249_s4] ss:$0 sm:$0xff] (!%p197_p6) }
  0x10   : > { %828 = vmatpush3.bf16.msra.mxu0 (!%p197_p6), %v956_v1 }
  0x11   : > { %829 = vmatprep.subr.bf16.mxu0 (!%p197_p6), %v957_v2  ;;  %844 = vmatpush3.bf16.msra.mxu1 (!%p197_p6), %v960_v4 }
  0x12   : > { %s233_s9 = scalar_select %p232_p7, %s1122_s29, 12  ;;  %845 = vmatprep.subr.bf16.mxu1 %v961_v10 }
  0x13   : > { %s536_s18 = ssub.s32 (%p1114_p4), 13, %s1122_s29  ;;  %s804_s27 = smul.u32 (%p1114_p4), 56, %s1102_s21 }
  0x14   : > { %s773_s14 = sshll.u32 %s233_s9, 3  ;;  %830 = vmatpush3.bf16.msra.mxu0 %v957_v2  ;;  %p537_p8 = scmp.lt.s32.totalorder (%p1114_p4), %s536_s18, 7 }
  0x15   : > { %s235_s17 = scalar_lea.vmem %s1245_s0, %s773_s14  ;;  %831 = vmatprep.subr.bf16.mxu0 %v958_v5  ;;  %846 = vmatpush3.bf16.msra.mxu1 %v961_v10  ;;  %s1196_s6 = scalar_lea.vmem (%p1114_p4), %s1250_s5, %s804_s27  }
  0x16   : > { %v247_v6 = vld [vmem:[%s235_s17] sm:$0xff]  ;;  %v248_v7 = vld [vmem:[%s235_s17 + $0x8] sm:$0xff]  ;;  %v249_v9 = vld [vmem:[%s235_s17 + $0x10] sm:$0xff]  ;;  %847 = vmatprep.subr.bf16.mxu1 %v962_v14 }
  0x17   : > { %v254_v8 = vpack.c.bf16 %v248_v7, %v247_v6  ;;  %v250_v11 = vld [vmem:[%s235_s17 + $0x18] sm:$0xff]  ;;  %v251_v12 = vld [vmem:[%s235_s17 + $0x20] sm:$0xff]  ;;  %v252_v13 = vld [vmem:[%s235_s17 + $0x28] sm:$0xff] }
  0x18   : > { %v255_v15 = vpack.c.bf16 %v250_v11, %v249_v9  ;;  %832 = vmatpush3.bf16.msra.mxu0 %v958_v5  ;;  %v256_v16 = vpack.c.bf16 %v252_v13, %v251_v12  ;;  %v253_v18 = vld [vmem:[%s235_s17 + $0x30] sm:$0xff]  ;;  %s865_s17 = smul.u32 56, %s224_s16 }
  0x19   : > { %833 = vmatprep.mubr.msk.bf16.mxu0 %vm297_vm0, %v254_v8  ;;  %848 = vmatpush3.bf16.msra.mxu1 %v962_v14  ;;  %v257_v20 = vpack.c.bf16 %v253_v18, %v253_v18 }
  0x1a   : > { %849 = vmatprep.subr.bf16.mxu1 %v963_v17  ;;  %s1173_s24 = scalar_lea.vmem [#allocation2], %s865_s17  }
  0x1b   : > { %834 = vmatmul.mubr.msk.bf16.vlgmr.msra.gmra.mrb[0].mxu0 %vm297_vm0, %v255_v15 }
  0x1c   : > { %837 = vmatprep.mubr.msk.bf16.mxu0 %vm297_vm0, %v256_v16 }
  0x1d   : > { %850 = vmatpush3.bf16.msra.mxu1 %v963_v17 }
  0x1e   : > { %851 = vmatprep.subr.bf16.mxu1 %v964_v19 }
  0x21   : > { %852 = vmatpush3.bf16.msra.mxu1 %v964_v19 }
  0x22   : > { %853 = vmatprep.subr.bf16.mxu1 %v965_v21 }
  0x23   : > { %838 = vmatmul.mubr.msk.bf16.gmra.mrb[4].mxu0 %vm297_vm0, %v257_v20 }
  0x25   : > { %854 = vmatpush3.bf16.msra.mxu1 %v965_v21 }
  0x26   : > { %855 = vmatprep.subr.bf16.mxu1 %v966_v22 }
  0x29   : > { %856 = vmatpush3.bf16.msra.mxu1 %v966_v22 }
  0xee   : > { %v835_v24 = vpop.f32.mrb[0].mxu0 }
  0xef   : > { %v353_v25 = vadd.f32 %v835_v24, %v774_v23  ;;  %v344_v26 = vpop.f32.mrb[1].mxu0 }
  0xf0   : > { %v345_v27 = vadd.f32 %v774_v23, %v344_v26  ;;  %v836_v28 = vpop.f32.mrb[2].mxu0 }
  0xf1   : > { %v356_v29 = vadd.f32 %v836_v28, %v774_v23  ;;  %v347_v30 = vpop.f32.mrb[3].mxu0  ;;  %v376_v32 = vmax.f32 %v353_v25, 0.0 }
  0xf2   : > { %v348_v31 = vadd.f32 %v774_v23, %v347_v30  ;;  %v374_v34 = vmax.f32 %v345_v27, 0.0 }
  0xf3   : > { %v377_v33 = vmax.f32 %v356_v29, 0.0 }
  0xf4   : > { %v375_v35 = vmax.f32 %v348_v31, 0.0 }
  0xf5   : > { %v382_v36 = vpack.c.bf16 %v377_v33, %v376_v32 }
  0xf6   : > { %v839_v37 = vpop.f32.mrb[4].mxu0  ;;  %v381_v38 = vpack.c.bf16 %v375_v35, %v374_v34 }
  0xf7   : > { %v369_v39 = vadd.f32 %v839_v37, %v774_v23  ;;  %v360_v40 = vpop.f32.mrb[5].mxu0 }
  0xf8   : > { %v361_v41 = vadd.f32 %v774_v23, %v360_v40  ;;  %v840_v42 = vpop.f32.mrb[6].mxu0  ;;  %857 = vmatprep.mubr.bf16.mxu1 %v381_v38 }
  0xf9   : > { %v363_v43 = vpop.f32.mrb[7].mxu0  ;;  %858 = vmatmul.mubr.bf16.vlgmr.msra.gmra.mrb[0].mxu1 %v382_v36  ;;  %v380_v45 = vmax.f32 %v369_v39, 0.0 }
  0xfa   : > { %v364_v44 = vadd.f32 %v774_v23, %v363_v43  ;;  %v378_v46 = vmax.f32 %v361_v41, 0.0 }
  0xfb   : > { %v384_v49 = vpack.c.bf16 %v380_v45, %v380_v45 }
  0xfc   : > { %v379_v47 = vmax.f32 %v364_v44, 0.0 }
  0xfe   : > { %v383_v48 = vpack.c.bf16 %v379_v47, %v378_v46 }
 0x100   : > { %861 = vmatprep.mubr.bf16.mxu1 %v383_v48 }
 0x101   : > { %862 = vmatmul.mubr.bf16.gmra.mrb[4].mxu1 %v384_v49 }
 0x1cc   : > { %v859_v51 = vpop.f32.mrb[0].mxu1 }
 0x1cd   : > { %v499_v52 = vadd.f32 %v859_v51, %v783_v50  ;;  %v490_v53 = vpop.f32.mrb[1].mxu1 }
 0x1ce   : > { %v491_v54 = vadd.f32 %v783_v50, %v490_v53  ;;  %v860_v55 = vpop.f32.mrb[2].mxu1 }
 0x1cf   : > { %523 = vst.msk [vmem:[%s1173_s24 + $0x10] sm:$0xff] %vm520_vm1, %v499_v52  ;;  %v502_v56 = vadd.f32 %v860_v55, %v783_v50  ;;  %v493_v57 = vpop.f32.mrb[3].mxu1 }
 0x1d0   : > { %521 = vst.msk [vmem:[%s1173_s24] sm:$0xff] %vm520_vm1, %v491_v54  ;;  %v494_v58 = vadd.f32 %v783_v50, %v493_v57 }
 0x1d1   : > { %524 = vst.msk [vmem:[%s1173_s24 + $0x18] sm:$0xff] %vm520_vm1, %v502_v56 }
 0x1d2   : > { %522 = vst.msk [vmem:[%s1173_s24 + $0x8] sm:$0xff] %vm520_vm1, %v494_v58 }
 0x1d4   : > { %v863_v59 = vpop.f32.mrb[4].mxu1  ;;  %534 = sbr.rel (!%p1114_p4) target bundleno = 536 (0x218), region = 44 }
 0x1d5   : > { %v515_v60 = vadd.f32 %v863_v59, %v783_v50  ;;  %v506_v61 = vpop.f32.mrb[5].mxu1 }
 0x1d6   : > { %v507_v62 = vadd.f32 %v783_v50, %v506_v61  ;;  %v864_v63 = vpop.f32.mrb[6].mxu1 }
 0x1d7   : > { %527 = vst.msk [vmem:[%s1173_s24 + $0x30] sm:$0xff] %vm520_vm1, %v515_v60  ;;  %v509_v0 = vpop.f32.mrb[7].mxu1 }
 0x1d8   : > { %525 = vst.msk [vmem:[%s1173_s24 + $0x20] sm:$0xff] %vm520_vm1, %v507_v62  ;;  %v510_v1 = vadd.f32 %v783_v50, %v509_v0 }
 0x1da   : > { %526 = vst.msk [vmem:[%s1173_s24 + $0x28] sm:$0xff] %vm520_vm1, %v510_v1 }
 0x1db   : > { %s1259_s18 = smov (!%p537_p8, %s536_s18), 7 }
 0x1dc   : > { %s792_s7 = sshll.u32 %s1259_s18, 7 }
 0x1dd   : > { %p795_p9 = scmp.eq.s32.totalorder %s792_s7, 0 }
 0x1de   : > { %967 = sdivrem.u32 (!%p795_p9), %s1259_s18, 7 }
 0x1df   : > { %545 = sbr.rel (%p795_p9) target bundleno = 536 (0x218), region = 48 }
 0x1e7   : > { %s1202_s26 = spop.drf %967 }
 0x1e8   : > { %p796_p10 = scmp.le.s32.totalorder %s1202_s26, 0 }
 0x1e9   : > { %s1252_s21 = smov (!%p796_p10), %s1196_s6  ;;  %s1253_s29 = smov (!%p796_p10), %s1173_s24 }
 0x1ea   : > { %725 = sbr.rel (%p796_p10) target bundleno = 507 (0x1fb), region = 124  ;;  %s1211_s8 = smov (!%p796_p10), 0  }
 0x1eb   : > { %s1213_s9 = smov (!%p796_p10), 0  }
 0x1f1 LB: >> { %v621_v2 = vld [vmem:[%s1033_s29] sm:$0xff]  ;;  %v623_v3 = vld [vmem:[%s1033_s29 + $0x8] sm:$0xff]  ;;  %v625_v4 = vld [vmem:[%s1033_s29 + $0x10] sm:$0xff]  ;;  %s635_s10 = sadd.s32 1, %s1037_s8  ;;  %s615_s9 = sadd.s32 1, %s1041_s9   ;;  %s1041_s9 = sphi %s1213_s9, %s615_s9   ;;  %s1037_s8 = sphi %s1211_s8, %s1254_s8   ;;  %s1033_s29 = sphi %s1253_s29, %s640_s29   ;;  %s1029_s21 = sphi %s1252_s21, %s641_s21  }
 0x1f2   : >> { %622 = vst [vmem:[%s1029_s21] sm:$0xff] %v621_v2  ;;  %624 = vst [vmem:[%s1029_s21 + $0x8] sm:$0xff] %v623_v3  ;;  %v627_v5 = vld [vmem:[%s1033_s29 + $0x18] sm:$0xff]  ;;  %v629_v6 = vld [vmem:[%s1033_s29 + $0x20] sm:$0xff]  ;;  %p636_p11 = scmp.ge.s32.totalorder %s635_s10, %s1202_s26  ;;  %p614_p12 = scmp.ge.s32.totalorder %s615_s9, %s1202_s26 }
 0x1f3   : >> { %626 = vst [vmem:[%s1029_s21 + $0x10] sm:$0xff] %v625_v4  ;;  %v631_v7 = vld [vmem:[%s1033_s29 + $0x28] sm:$0xff]  ;;  %628 = vst [vmem:[%s1029_s21 + $0x18] sm:$0xff] %v627_v5  ;;  %v633_v8 = vld [vmem:[%s1033_s29 + $0x30] sm:$0xff] }
 0x1f4   : >> { %630 = vst [vmem:[%s1029_s21 + $0x20] sm:$0xff] %v629_v6  ;;  %632 = vst [vmem:[%s1029_s21 + $0x28] sm:$0xff] %v631_v7  ;;  %s1261_s10 = smov (%p636_p11, %s635_s10), 0  ;;  %617 = sbr.rel (!%p614_p12) target bundleno = 497 (0x1f1), region = 130 }
 0x1f5   : >> { %634 = vst [vmem:[%s1029_s21 + $0x30] sm:$0xff] %v633_v8  ;;  %s638_s11 = smul.u32 56, %s1261_s10  ;;  %s1254_s8 = smov %s1261_s10 }
 0x1f7   : >> { %s640_s29 = scalar_lea.vmem %s1173_s24, %s638_s11 [#allocation2]   ;;  %s641_s21 = scalar_lea.vmem %s1196_s6, %s638_s11  }
 0x1fb PF: > { %969 = sdivrem.u32 %s1259_s18, 7 }
 0x1fc   : > { %s797_s12 = smul.u32 56, %s1202_s26 }
 0x1fe   : > { %s646_s13 = scalar_lea.vmem %s1173_s24, %s797_s12 [#allocation2]   ;;  %s648_s14 = scalar_lea.vmem %s1196_s6, %s797_s12  }
 0x204   : > { %s970_s15 = spop.drf %969 }
 0x205   : > { %p799_p13 = scmp.le.s32.totalorder %s970_s15, 0 }
 0x206   : > { %s1043_s16 = smov (!%p799_p13), %s648_s14   ;;  %s1047_s17 = smov (!%p799_p13), %s646_s13  }
 0x207   : > { %739 = sbr.rel (%p799_p13) target bundleno = 536 (0x218), region = 135  ;;  %s1051_s20 = smov (!%p799_p13), 0  }
 0x208   : > { %s1055_s23 = smov (!%p799_p13), 0  }
 0x20e LB: >> { %v658_v9 = vld [vmem:[%s1049_s17] sm:$0xff]  ;;  %s660_s27 = sadd.s32 1, %s1053_s20  ;;  %s652_s23 = sadd.s32 1, %s1057_s23   ;;  %s1057_s23 = sphi %s1055_s23, %s652_s23   ;;  %s1053_s20 = sphi %s1051_s20, %s1052_s20   ;;  %s1049_s17 = sphi %s1047_s17, %s665_s17   ;;  %s1045_s16 = sphi %s1043_s16, %s666_s16  }
 0x20f   : >> { %659 = vst [vmem:[%s1045_s16] sm:$0xff] %v658_v9  ;;  %p661_p0 = scmp.ge.s32.totalorder %s660_s27, %s970_s15  ;;  %p651_p1 = scmp.ge.s32.totalorder %s652_s23, %s970_s15 }
 0x211   : >> { %s1263_s27 = smov (%p661_p0, %s660_s27), 0  ;;  %654 = sbr.rel (!%p651_p1) target bundleno = 526 (0x20e), region = 141 }
 0x212   : >> { %s800_s24 = sshll.u32 %s1263_s27, 3  ;;  %s1052_s20 = smov %s1263_s27  }
 0x213   : >> { %s665_s17 = scalar_lea.vmem %s646_s13, %s800_s24 [#allocation2]   ;;  %s666_s16 = scalar_lea.vmem %s648_s14, %s800_s24  }
 0x218 PF: > { %p12_p2 = scmp.ge.s32.totalorder %s1104_s22, 4   ;;  %s1255_s18 = smov %s1021_s19 }
 0x219   : > { %s1256_s19 = smov %s1112_s25  ;;  %s1257_s20 = smov %s1104_s22 }
 0x21a   :  { %14 = sbr.rel (!%p12_p2) target bundleno = 2 (0x2), region = 152 }

</bundles_post_ra>
